<compile_context>
chip_gen: v6e
topology: v6e:2x2x1
jax: 0.10.0
libtpu: 0.0.40
codegen_flags: <defaults>
</compile_context>

<pallas_src>
import jax
import jax.numpy as jnp
from jax.experimental import pallas as pl
from jax.experimental.pallas import tpu as pltpu

LANE = 128
NO_GRID_MAX_BATCH = 256  # above this, always emit >= 2 grid tiles (v7x megacore)


def _round_up(x: int, m: int) -> int:
    return ((x + m - 1) // m) * m


def _linear_kernel(x_ref, w_ref, b_ref, o_ref):
    # x_ref: [TM, in_f]   w_ref: [in_f, out_p]   b_ref: [1, out_p]   o_ref: [TM, out_f]
    acc = jnp.dot(x_ref[...], w_ref[...], preferred_element_type=jnp.float32)  # MXU
    y = acc + b_ref[...]                                                        # VPU
    # Narrow (masked) store of only the real output features.
    o_ref[...] = y[:, : o_ref.shape[-1]].astype(o_ref.dtype)


def prep_linear_params(weight: jax.Array, bias: jax.Array, lane: int = LANE):
    """One-time prep: transpose PyTorch-convention W [out_f, in_f] -> [in_f, out_p]
    (padded only on the output/lane axis) and bias [out_f] -> [1, out_p]."""
    out_f, in_f = weight.shape
    out_p = _round_up(out_f, lane)
    w_t_pad = jnp.zeros((in_f, out_p), weight.dtype).at[:, :out_f].set(weight.T)
    b_pad = jnp.zeros((1, out_p), bias.dtype).at[0, :out_f].set(bias)
    return w_t_pad, b_pad


def _resident_spec(block_shape):
    """BlockSpec for an operand identical across all grid steps: constant
    index_map + single pipeline buffer (second buffer would be dead VMEM)."""
    index_map = lambda i: (0,) * len(block_shape)
    try:
        return pl.BlockSpec(block_shape, index_map, pipeline_mode=pl.Buffered(1))
    except (AttributeError, TypeError, ValueError):
        # Older JAX without pipeline_mode / Buffered: default double buffering.
        return pl.BlockSpec(block_shape, index_map)


def pallas_linear(x: jax.Array, w_t_pad: jax.Array, b_pad: jax.Array, *,
                  out_features: int, block_batch: int = 4096) -> jax.Array:
    """y = x @ W^T + b.

    x:        [B, in_features]           (unpadded)
    w_t_pad:  [in_features, out_p]       (pre-transposed, out axis zero-padded)
    b_pad:    [1, out_p]                 (zero-padded)
    returns:  [B, out_features]          (unpadded)
    """
    B, in_f = x.shape
    in_f_w, out_p = w_t_pad.shape
    assert in_f == in_f_w, (in_f, in_f_w)
    assert out_features <= out_p, (out_features, out_p)

    itm = jnp.dtype(x.dtype).itemsize
    cost = pl.CostEstimate(
        flops=2 * B * in_f * out_features,                 # real, unpadded dims
        transcendentals=0,
        bytes_accessed=itm * (B * in_f + B * out_features + in_f * out_p + out_p),
    )
    out_shape = jax.ShapeDtypeStruct((B, out_features), x.dtype)

    if B <= NO_GRID_MAX_BATCH:
        # Tiny/typical batch: single block, no grid -> no pipeline bookkeeping.
        return pl.pallas_call(
            _linear_kernel,
            out_shape=out_shape,
            in_specs=[
                pl.BlockSpec(memory_space=pltpu.MemorySpace.VMEM),
                pl.BlockSpec(memory_space=pltpu.MemorySpace.VMEM),
                pl.BlockSpec(memory_space=pltpu.MemorySpace.VMEM),
            ],
            out_specs=pl.BlockSpec(memory_space=pltpu.MemorySpace.VMEM),
            cost_estimate=cost,
        )(x, w_t_pad, b_pad)

    # Grid path: stream batch tiles; weight + bias resident.  Always produce at
    # least 2 tiles so both v7x TensorCores (and their HBM bandwidth) are used.
    block_batch = _round_up(max(block_batch, 8), 8)
    tm = min(block_batch, _round_up(pl.cdiv(B, 2), 8))
    grid = (pl.cdiv(B, tm),)
    return pl.pallas_call(
        _linear_kernel,
        out_shape=out_shape,
        grid=grid,
        in_specs=[
            pl.BlockSpec((tm, in_f), lambda i: (i, 0)),   # streamed, unpadded x
            _resident_spec((in_f, out_p)),                 # resident W^T
            _resident_spec((1, out_p)),                    # resident bias
        ],
        out_specs=pl.BlockSpec((tm, out_features), lambda i: (i, 0)),
        compiler_params=pltpu.CompilerParams(
            dimension_semantics=("parallel",)),
        cost_estimate=cost,
    )(x, w_t_pad, b_pad)


if __name__ == "__main__":
    key = jax.random.PRNGKey(0)
    k_x, k_w, k_b, k_x2 = jax.random.split(key, 4)

    in_features = 10
    out_features = 10
    batch = 8

    # Deterministic params mirroring torch.nn.Linear default init
    # (uniform in [-1/sqrt(in_features), 1/sqrt(in_features)]).
    bound = 1.0 / float(in_features) ** 0.5
    weight = jax.random.uniform(
        k_w, (out_features, in_features), dtype=jnp.float32,
        minval=-bound, maxval=bound)
    bias = jax.random.uniform(
        k_b, (out_features,), dtype=jnp.float32, minval=-bound, maxval=bound)

    # One-time parameter prep (outside the hot path).
    w_t_pad, b_pad = prep_linear_params(weight, bias)

    x = jax.random.normal(k_x, (batch, in_features), dtype=jnp.float32)
    inputs = {"x": x}  # matches the module's dict-of-tensors interface

    # Small-batch path (no grid).
    y = pallas_linear(inputs["x"], w_t_pad, b_pad, out_features=out_features)
    y = jax.block_until_ready(y)
    y_ref = inputs["x"] @ weight.T + bias
    assert y.shape == (batch, out_features), y.shape
    assert jnp.allclose(y, y_ref, atol=1e-5, rtol=1e-5), "mismatch vs reference"

    # Batch-tiled path (>= 2 tiles, resident weight, partial last tile).
    x_big = jax.random.normal(k_x2, (1000, in_features), dtype=jnp.float32)
    y_big = pallas_linear(x_big, w_t_pad, b_pad, out_features=out_features)
    y_big = jax.block_until_ready(y_big)
    y_big_ref = x_big @ weight.T + bias
    assert y_big.shape == (1000, out_features), y_big.shape
    assert jnp.allclose(y_big, y_big_ref, atol=1e-5, rtol=1e-5), \
        "mismatch vs reference (tiled path)"

    print("KERNEL_OK")
</pallas_src>

<mosaic_0001>
module attributes {stable_mosaic.version = 11 : i64} {
  func.func @_linear_kernel(%arg0: memref<8x10xf32, #tpu.memory_space<vmem>>, %arg1: memref<10x128xf32, #tpu.memory_space<vmem>>, %arg2: memref<1x128xf32, #tpu.memory_space<vmem>>, %arg3: memref<8x10xf32, #tpu.memory_space<vmem>>) attributes {dimension_semantics = [], scalar_prefetch = 0 : i64, scratch_operands = 0 : i64, tpu.core_type = #tpu.core_type<tc>} {
    %c0 = arith.constant 0 : index
    %c0_0 = arith.constant 0 : index
    %0 = vector.load %arg0[%c0, %c0_0] : memref<8x10xf32, #tpu.memory_space<vmem>>, vector<8x10xf32>
    %c0_1 = arith.constant 0 : index
    %c0_2 = arith.constant 0 : index
    %1 = vector.load %arg1[%c0_1, %c0_2] : memref<10x128xf32, #tpu.memory_space<vmem>>, vector<10x128xf32>
    %cst = arith.constant dense<0.000000e+00> : vector<8x128xf32>
    %2 = tpu.matmul %0, %1, %cst {dimension_numbers = #tpu.dot_dimension_numbers<[1], [0], [0], [1], [0, 0, 1, 1], [], []>} : vector<8x10xf32>, vector<10x128xf32>, vector<8x128xf32> -> vector<8x128xf32>
    %c0_3 = arith.constant 0 : index
    %c0_4 = arith.constant 0 : index
    %3 = vector.load %arg2[%c0_3, %c0_4] : memref<1x128xf32, #tpu.memory_space<vmem>>, vector<1x128xf32>
    %4 = vector.broadcast %3 : vector<1x128xf32> to vector<8x128xf32>
    %5 = arith.addf %2, %4 : vector<8x128xf32>
    %6 = vector.extract_strided_slice %5 {offsets = [0, 0], sizes = [8, 10], strides = [1, 1]} : vector<8x128xf32> to vector<8x10xf32>
    %c0_5 = arith.constant 0 : index
    %c0_6 = arith.constant 0 : index
    %7 = vector.load %arg3[%c0_5, %c0_6] : memref<8x10xf32, #tpu.memory_space<vmem>>, vector<8x10xf32>
    tpu.vector_store %arg3[%c0_5, %c0_6], %6 {strides = array<i32>} : memref<8x10xf32, #tpu.memory_space<vmem>>, vector<8x10xf32>,
    return
  }
}

</mosaic_0001>

<bundles_post_ra>
// kernel: tpu_custom_call.1
= control target key start
LH: loop header
LB: loop body
LE: loop exit
PB: predicated region body
PF: predicated region fallthrough
CT: control target
= control target key end

     0   :  { %8 = vsyncpa [#allocation3], 0  ;;  %s271_s0 = inlined_call_operand.hbm [shape: f32[8,10], index: 0, kind: input, shape index: {}]   ;;  %s272_s1 = inlined_call_operand.hbm [shape: f32[10,128], index: 1, kind: input, shape index: {}]   ;;  %s273_s2 = inlined_call_operand.vmem [shape: f32[1,128], index: 2, kind: input, shape index: {}]   ;;  %s274_s3 = inlined_call_operand.hbm [shape: f32[8,10], index: 3, kind: output, shape index: {}]  }
   0x1   :  { %9 = vsyncpa [#allocation6], 0 }
   0x2   :  { %10 = vsyncpa [#allocation4], 0  ;;  %s232_s12 = smov [#allocation2]   ;;  %s233_s14 = smov [#allocation5]  }
   0x3   :  { %s17_s13 = sshll.u32 %s232_s12, 4  ;;  %s26_s15 = sshll.u32 %s233_s14, 4  ;;  %s18_s13 = int_to_ptr.vmem [resolvable:$true] %s17_s13  ;;  %s27_s15 = int_to_ptr.vmem [resolvable:$true] %s26_s15 }
   0x4   :  { %s174_s16 = scalar_lea.vmem %s18_s13, 128  ;;  %p179_p1 = scmp.lt.s32.totalorder %s18_s13, %s18_s13 }
   0x5   :  { %p175_p0 = scmp.ne.s32.totalorder %s18_s13, %s174_s16  ;;  %p180_p2 = scmp.lt.s32.totalorder %s174_s16, %s174_s16 }
   0x7   :  { %p181_p3 = por %p180_p2, %p179_p1 }
   0x9   :  { %p182_p4 = pnand %p181_p3, %p175_p0 }
   0xb   :  { %185 = shalt.err (!%p182_p4)
}
   0xc   :  { %20 = dma.hbm_to_vmem [thread:$0]  %s271_s0, 128, %s18_s13, [#allocation3]  }
   0xd   :  { %s194_s19 = scalar_lea.vmem %s27_s15, 256  ;;  %p199_p6 = scmp.lt.s32.totalorder %s27_s15, %s27_s15 }
   0xe   :  { %p195_p5 = scmp.ne.s32.totalorder %s27_s15, %s194_s19  ;;  %p200_p7 = scmp.lt.s32.totalorder %s194_s19, %s194_s19 }
  0x10   :  { %p201_p8 = por %p200_p7, %p199_p6 }
  0x12   :  { %p202_p9 = pnand %p201_p8, %p195_p5 }
  0x14   :  { %205 = shalt.err (!%p202_p9)
}
  0x15   :  { %s234_s20 = smov 128   ;;  %s235_s21 = smov 8  }
  0x16   :  { %32 = dma.hbm_to_vmem [thread:$0]  %s272_s1, 256, %s27_s15, [#allocation6], %s234_s20, %s234_s20, %s235_s21  }
  0x17   :  { %226 = dma.done.wait [#allocation3], 128  }
  0x18   :  { %227 = vsyncadd [#allocation3], 4294967168 }
  0x19   :  { %228 = dma.done.wait [#allocation6], 256  }
  0x1a   :  { %229 = vsyncadd [#allocation6], 4294967040  ;;  %v236_v0 = vmov 0.0   ;;  %vm237_vm0 = vmmov 0   ;;  %vm55_vm1 = vcmask 1041408   ;;  %v42_v2 = vld [vmem:[#allocation5] sm:$0xff] }
  0x1b   :  { %152 = vmatprep.subr.mxu0 %v236_v0  ;;  %156 = vmatprep.mubr.msk.f32.mxu0 %vm237_vm0, %v236_v0  ;;  %v43_v1 = vld [vmem:[#allocation5 + $0x8] sm:$0x3]  ;;  %v41_v3 = vld [vmem:[#allocation2] sm:$0xff]  ;;  %vm51_vm2 = vcmask 80896   ;;  %s238_s1 = smov [#allocation7]  }
  0x1c   :  { %153 = vmatpush3.msk.msra.mxu0 %vm55_vm1, %v43_v1  ;;  %v146_v4 = vld [vmem:[%s273_s2] ss:$0 sm:$0xff]  ;;  %s136_s25 = sshll.u32 %s238_s1, 4  ;;  %s137_s25 = int_to_ptr.vmem [resolvable:$true] %s136_s25 }
  0x1d   :  { %154 = vmatprep.subr.mxu0 %v236_v0  ;;  %s206_s26 = scalar_lea.vmem %s137_s25, 128  ;;  %p211_p11 = scmp.lt.s32.totalorder %s137_s25, %s137_s25 }
  0x1e   :  { %155 = vmatpush3.msra.mxu0 %v42_v2  ;;  %p207_p10 = scmp.ne.s32.totalorder %s137_s25, %s206_s26  ;;  %p212_p12 = scmp.lt.s32.totalorder %s206_s26, %s206_s26 }
  0x1f   :  { %157 = vmatmul.mubr.msk.f32.vlgmr.msra.gmra.mxu0 %vm51_vm2, %v41_v3 }
  0x20   :  { %p213_p13 = por %p212_p12, %p211_p11 }
  0x22   :  { %p214_p0 = pnand %p213_p13, %p207_p10 }
  0xdf   :  { %v125_v5 = vpop.f32.mrf.mxu0 }
  0xe0   :  { %v126_v6 = vadd.f32 %v146_v4, %v125_v5 }
  0xe1   :  { %v158_v7 = vpop.f32.mrf.mxu0 }
  0xe2   :  { %129 = vst.msk [vmem:[#allocation7] sm:$0xff] %vm51_vm2, %v126_v6 }
  0xe3   :  { %217 = shalt.err (!%p214_p0)
}
  0xe4   :  { %139 = dma.vmem_to_hbm [thread:$0]  %s137_s25, 128, %s274_s3, [#allocation4]  }
  0xe5   :  { %230 = dma.done.wait [#allocation4], 128  }
  0xe6   :  { %231 = vsyncadd [#allocation4], 4294967168 }
  0xe7   :  { %143 = vsyncpa [#allocation3], 1 }
  0xe8   :  { %144 = vsyncpa [#allocation6], 1 }
  0xe9   :  { %145 = vsyncpa [#allocation4], 1 }

</bundles_post_ra>
